<compile_context>
chip_gen: v7x
topology: tpu7x:2x2x1
jax: 0.10.0
libtpu: 0.0.40
codegen_flags: <defaults>
</compile_context>

<pallas_src>
import numpy as np
import jax
import jax.numpy as jnp
from jax.experimental import pallas as pl
from jax.experimental.pallas import tpu as pltpu


def _cdiv(a, b):
    return (a + b - 1) // b


def _round_up(x, m):
    return ((x + m - 1) // m) * m


def make_trend_bases(degree_of_polynomial, backcast_size, forecast_size):
    """Deterministic parameter construction, mirroring TrendBasis.__init__."""
    polynomial_size = degree_of_polynomial + 1
    n = forecast_size + backcast_size
    total_grid = np.concatenate(
        [np.power(np.arange(n, dtype=np.float64) / n, i)[None, :]
         for i in range(polynomial_size)],
        axis=0,
    ).astype(np.float32) ** 0.75     # the ** 0.75 matches the reference module
    backcast_template = total_grid[:, :backcast_size]   # (P, Tb)
    forecast_template = total_grid[:, backcast_size:]   # (P, Tf)
    return jnp.asarray(backcast_template), jnp.asarray(forecast_template)


def prepare_trend_basis(degree_of_polynomial, backcast_size, forecast_size):
    """Build the constant bases once, including the lane-dense expanded form."""
    backcast_basis, forecast_basis = make_trend_bases(
        degree_of_polynomial, backcast_size, forecast_size)
    P = degree_of_polynomial + 1
    pack = max(1, 128 // P)
    if pack > 1:
        eye = jnp.eye(pack, dtype=backcast_basis.dtype)
        bb_packed = jnp.kron(eye, backcast_basis)   # (pack*P, pack*Tb)
        fb_packed = jnp.kron(eye, forecast_basis)   # (pack*P, pack*Tf)
    else:
        bb_packed, fb_packed = backcast_basis, forecast_basis
    return {
        "P": P, "Tb": backcast_size, "Tf": forecast_size, "pack": pack,
        "backcast_basis": backcast_basis, "forecast_basis": forecast_basis,
        "backcast_basis_packed": bb_packed, "forecast_basis_packed": fb_packed,
    }


def _trend_basis_kernel(theta_ref, bb_ref, fb_ref, back_ref, fore_ref):
    # theta_ref: (bm, Kd) tile of rows.
    # bb_ref/fb_ref: (Kd, Tb'), (Kd, Tf') bases, resident in VMEM across grid
    # steps (constant index_map).  Two dots -> two lane-dense output stores.
    th = theta_ref[...]
    back_ref[...] = jnp.dot(
        th, bb_ref[...], preferred_element_type=jnp.float32).astype(back_ref.dtype)
    fore_ref[...] = jnp.dot(
        th, fb_ref[...], preferred_element_type=jnp.float32).astype(fore_ref.dtype)


def trend_basis_forward(theta, params, *, block_m=2048):
    """theta: (B, K, P) float32 -> (backcast (B, K, Tb), forecast (B, K, Tf))."""
    B, K, P = theta.shape
    Tb, Tf = params["Tb"], params["Tf"]
    assert P == params["P"]
    M = B * K
    pack = params["pack"]

    if pack > 1 and M % pack == 0:
        # Lane-dense layout: fold `pack` consecutive theta rows into one
        # (pack*P)-wide row (contiguous reshape, no copy) and use the
        # block-diagonal expanded bases.
        rows = M // pack
        theta2 = theta.reshape(rows, pack * P)
        bb = params["backcast_basis_packed"]
        fb = params["forecast_basis_packed"]
        out_tb, out_tf = pack * Tb, pack * Tf
    else:
        rows = M
        theta2 = theta.reshape(M, P)
        bb = params["backcast_basis"]
        fb = params["forecast_basis"]
        out_tb, out_tf = Tb, Tf

    Kd = theta2.shape[1]

    # Cap the row tile so the double-buffered working set stays well inside the
    # smallest scoped-VMEM budget we target (conservative for v7x / v5e).
    bytes_per_row = 4 * (Kd + out_tb + out_tf)
    vmem_budget = 24 * 1024 * 1024
    block_m_eff = max(8, min(block_m, (vmem_budget // (2 * bytes_per_row)) // 8 * 8))

    if rows <= block_m_eff:
        # Single step: forcing a split here is pure overhead on single-TC chips.
        bm = rows
        grid_m = 1
    else:
        # Enough work to split: target >= 4 steps so both v7x TensorCores get
        # >= 2 steps each and DMA / writeback overlap with compute.
        steps = max(_cdiv(rows, block_m_eff), 4)
        bm = _round_up(_cdiv(rows, steps), 8)
        grid_m = _cdiv(rows, bm)        # ragged last block is masked, no padding

    basis_bytes = 4 * Kd * (out_tb + out_tf)
    tile_bytes = 4 * bm * (Kd + out_tb + out_tf)
    vmem_limit = int(min(max(2 * (tile_bytes + basis_bytes) + (4 << 20),
                             32 << 20), 64 << 20))

    cost = pl.CostEstimate(
        flops=2 * rows * Kd * (out_tb + out_tf),
        transcendentals=0,
        bytes_accessed=4 * (rows * Kd + Kd * (out_tb + out_tf)
                            + rows * (out_tb + out_tf)),
    )

    back2, fore2 = pl.pallas_call(
        _trend_basis_kernel,
        out_shape=(
            jax.ShapeDtypeStruct((rows, out_tb), theta.dtype),
            jax.ShapeDtypeStruct((rows, out_tf), theta.dtype),
        ),
        grid_spec=pltpu.PrefetchScalarGridSpec(
            num_scalar_prefetch=0,
            grid=(grid_m,),
            in_specs=[
                pl.BlockSpec((bm, Kd), lambda i: (i, 0)),       # theta row tile
                pl.BlockSpec((Kd, out_tb), lambda i: (0, 0)),   # basis: resident
                pl.BlockSpec((Kd, out_tf), lambda i: (0, 0)),   # basis: resident
            ],
            out_specs=[
                pl.BlockSpec((bm, out_tb), lambda i: (i, 0)),
                pl.BlockSpec((bm, out_tf), lambda i: (i, 0)),
            ],
        ),
        compiler_params=pltpu.CompilerParams(
            dimension_semantics=("parallel",),
            vmem_limit_bytes=vmem_limit,
        ),
        cost_estimate=cost,
    )(theta2, bb, fb)

    # Contiguous reshapes (free): packed (rows, pack*T) -> (M, T) -> (B, K, T).
    backcast = back2.reshape(B, K, Tb)
    forecast = fore2.reshape(B, K, Tf)
    return backcast, forecast


if __name__ == "__main__":
    # Small deterministic example shapes.
    degree_of_polynomial = 3          # -> P = 4, pack = 32
    backcast_size = 16                # Tb  (pack*Tb = 512, lane-dense)
    forecast_size = 8                 # Tf  (pack*Tf = 256, lane-dense)
    P = degree_of_polynomial + 1

    params = prepare_trend_basis(degree_of_polynomial, backcast_size, forecast_size)
    bb, fb = params["backcast_basis"], params["forecast_basis"]

    k1, k2 = jax.random.split(jax.random.PRNGKey(0))

    # Case 1: M = B*K divisible by pack -> lane-dense packed path.
    B, K = 2, 16
    theta = jax.random.normal(k1, (B, K, P), dtype=jnp.float32)
    backcast, forecast = trend_basis_forward(theta, params)
    backcast = jax.block_until_ready(backcast)
    forecast = jax.block_until_ready(forecast)
    assert backcast.shape == (B, K, backcast_size)
    assert forecast.shape == (B, K, forecast_size)
    np.testing.assert_allclose(
        np.asarray(backcast), np.asarray(jnp.einsum('bkp,pt->bkt', theta, bb)),
        rtol=1e-5, atol=1e-5)
    np.testing.assert_allclose(
        np.asarray(forecast), np.asarray(jnp.einsum('bkp,pt->bkt', theta, fb)),
        rtol=1e-5, atol=1e-5)

    # Case 2: M not divisible by pack -> plain (fallback) layout.
    B2, K2 = 2, 4
    theta_s = jax.random.normal(k2, (B2, K2, P), dtype=jnp.float32)
    backcast_s, forecast_s = trend_basis_forward(theta_s, params)
    backcast_s = jax.block_until_ready(backcast_s)
    forecast_s = jax.block_until_ready(forecast_s)
    np.testing.assert_allclose(
        np.asarray(backcast_s), np.asarray(jnp.einsum('bkp,pt->bkt', theta_s, bb)),
        rtol=1e-5, atol=1e-5)
    np.testing.assert_allclose(
        np.asarray(forecast_s), np.asarray(jnp.einsum('bkp,pt->bkt', theta_s, fb)),
        rtol=1e-5, atol=1e-5)

    print("KERNEL_OK")
</pallas_src>

<mosaic_0001>
module attributes {stable_mosaic.version = 11 : i64} {
  func.func @_trend_basis_kernel(%arg0: i32, %arg1: memref<1x128xf32, #tpu.memory_space<vmem>>, %arg2: memref<128x512xf32, #tpu.memory_space<vmem>>, %arg3: memref<128x256xf32, #tpu.memory_space<vmem>>, %arg4: memref<1x512xf32, #tpu.memory_space<vmem>>, %arg5: memref<1x256xf32, #tpu.memory_space<vmem>>) attributes {dimension_semantics = [#tpu.dimension_semantics<parallel>], iteration_bounds = array<i64: 1>, scalar_prefetch = 0 : i64, scratch_operands = 0 : i64, tpu.core_type = #tpu.core_type<tc>, window_params = [{transform_indices = @transform_0, window_bounds = array<i64: 1, 128>}, {pipeline_mode = #tpu.pipeline_mode<synchronous>, transform_indices = @transform_1, window_bounds = array<i64: 128, 512>}, {pipeline_mode = #tpu.pipeline_mode<synchronous>, transform_indices = @transform_2, window_bounds = array<i64: 128, 256>}, {transform_indices = @transform_3, window_bounds = array<i64: 1, 512>}, {transform_indices = @transform_4, window_bounds = array<i64: 1, 256>}]} {
    %c0 = arith.constant 0 : index
    %c0_0 = arith.constant 0 : index
    %0 = vector.load %arg1[%c0, %c0_0] : memref<1x128xf32, #tpu.memory_space<vmem>>, vector<1x128xf32>
    %c0_1 = arith.constant 0 : index
    %c0_2 = arith.constant 0 : index
    %1 = vector.load %arg2[%c0_1, %c0_2] : memref<128x512xf32, #tpu.memory_space<vmem>>, vector<128x512xf32>
    %cst = arith.constant dense<0.000000e+00> : vector<1x512xf32>
    %2 = tpu.matmul %0, %1, %cst {dimension_numbers = #tpu.dot_dimension_numbers<[1], [0], [0], [1], [0, 0, 1, 1], [], []>} : vector<1x128xf32>, vector<128x512xf32>, vector<1x512xf32> -> vector<1x512xf32>
    %c0_3 = arith.constant 0 : index
    %c0_4 = arith.constant 0 : index
    %3 = vector.load %arg4[%c0_3, %c0_4] : memref<1x512xf32, #tpu.memory_space<vmem>>, vector<1x512xf32>
    tpu.vector_store %arg4[%c0_3, %c0_4], %2 {strides = array<i32>} : memref<1x512xf32, #tpu.memory_space<vmem>>, vector<1x512xf32>,
    %c0_5 = arith.constant 0 : index
    %c0_6 = arith.constant 0 : index
    %4 = vector.load %arg3[%c0_5, %c0_6] : memref<128x256xf32, #tpu.memory_space<vmem>>, vector<128x256xf32>
    %cst_7 = arith.constant dense<0.000000e+00> : vector<1x256xf32>
    %5 = tpu.matmul %0, %4, %cst_7 {dimension_numbers = #tpu.dot_dimension_numbers<[1], [0], [0], [1], [0, 0, 1, 1], [], []>} : vector<1x128xf32>, vector<128x256xf32>, vector<1x256xf32> -> vector<1x256xf32>
    %c0_8 = arith.constant 0 : index
    %c0_9 = arith.constant 0 : index
    %6 = vector.load %arg5[%c0_8, %c0_9] : memref<1x256xf32, #tpu.memory_space<vmem>>, vector<1x256xf32>
    tpu.vector_store %arg5[%c0_8, %c0_9], %5 {strides = array<i32>} : memref<1x256xf32, #tpu.memory_space<vmem>>, vector<1x256xf32>,
    return
  }
  func.func @transform_0(%arg0: i32) -> (i32, i32) {
    %c0_i32 = arith.constant 0 : i32
    %c0_i32_0 = arith.constant 0 : i32
    return %arg0, %c0_i32 : i32, i32
  }
  func.func @transform_1(%arg0: i32) -> (i32, i32) {
    %c0_i32 = arith.constant 0 : i32
    %c0_i32_0 = arith.constant 0 : i32
    %c0_i32_1 = arith.constant 0 : i32
    return %c0_i32, %c0_i32_0 : i32, i32
  }
  func.func @transform_2(%arg0: i32) -> (i32, i32) {
    %c0_i32 = arith.constant 0 : i32
    %c0_i32_0 = arith.constant 0 : i32
    %c0_i32_1 = arith.constant 0 : i32
    return %c0_i32, %c0_i32_0 : i32, i32
  }
  func.func @transform_3(%arg0: i32) -> (i32, i32) {
    %c0_i32 = arith.constant 0 : i32
    %c0_i32_0 = arith.constant 0 : i32
    return %arg0, %c0_i32 : i32, i32
  }
  func.func @transform_4(%arg0: i32) -> (i32, i32) {
    %c0_i32 = arith.constant 0 : i32
    %c0_i32_0 = arith.constant 0 : i32
    return %arg0, %c0_i32 : i32, i32
  }
}

</mosaic_0001>

<bundles_post_ra>
// kernel: tpu_custom_call.1
= control target key start
LH: loop header
LB: loop body
LE: loop exit
PB: predicated region body
PF: predicated region fallthrough
CT: control target
= control target key end

     0   :  { %10 = vsyncpa [#allocation3], 0  ;;  %s776_s0 = inlined_call_operand.hbm [shape: f32[1,128], index: 0, kind: input, shape index: {}]   ;;  %s777_s1 = inlined_call_operand.hbm [shape: f32[128,512], index: 1, kind: input, shape index: {}]   ;;  %s778_s2 = inlined_call_operand.hbm [shape: f32[128,256], index: 2, kind: input, shape index: {}]   ;;  %s779_s3 = inlined_call_operand.hbm [shape: f32[1,512], index: 3, kind: output, shape index: {0}]   ;;  %s780_s4 = inlined_call_operand.hbm [shape: f32[1,256], index: 4, kind: output, shape index: {1}]  }
   0x1   :  { %11 = vsyncpa [#allocation6], 0 }
   0x2   :  { %12 = vsyncpa [#allocation4], 0 }
   0x3   :  { %13 = vsyncpa [#allocation10], 0  ;;  %s677_s15 = smov [#allocation5]   ;;  %s559_s19 = scalar_lea.hbm %s777_s1, 8192 }
   0x4   :  { %s29_s16 = sshll.u32 %s677_s15, 4  ;;  %p560_p0 = scmp.ne.s32.totalorder %s777_s1, %s559_s19  ;;  %s30_s16 = int_to_ptr.vmem [resolvable:$true] %s29_s16 }
   0x5   :  { %p563_p1 = scmp.lt.u32.totalorder %s559_s19, %s777_s1 }
   0x7   :  { %p565_p2 = pnand %p563_p1, %p560_p0 }
   0x9   :  { %568 = shalt.err (!%p565_p2)
}
   0xa   :  { %s569_s24 = scalar_lea.vmem %s30_s16, 8192  ;;  %p574_p4 = scmp.lt.s32.totalorder %s30_s16, %s30_s16 }
   0xb   :  { %p570_p3 = scmp.ne.s32.totalorder %s30_s16, %s569_s24  ;;  %p575_p5 = scmp.lt.s32.totalorder %s569_s24, %s569_s24 }
   0xd   :  { %p576_p6 = por %p575_p5, %p574_p4 }
   0xf   :  { %p577_p7 = pnand %p576_p6, %p570_p3 }
  0x11   :  { %580 = shalt.err (!%p577_p7)
}
  0x12   :  { %s678_s25 = smov 512   ;;  %s679_s26 = smov 32  }
  0x13   :  { %35 = dma.hbm_to_vmem [thread:$0]  %s777_s1, 8192, %s30_s16, [#allocation6], %s678_s25, %s678_s25, %s679_s26  }
  0x14   :  { %s680_s29 = smov [#allocation2]   ;;  %s681_s5 = smov [#allocation7]  }
  0x15   :  { %s20_s30 = sshll.u32 %s680_s29, 4  ;;  %s41_s6 = sshll.u32 %s681_s5, 4  ;;  %s21_s30 = int_to_ptr.vmem [resolvable:$true] %s20_s30  ;;  %s42_s6 = int_to_ptr.vmem [resolvable:$true] %s41_s6 }
  0x16   :  { %s581_s9 = scalar_lea.hbm %s776_s0, 16 }
  0x17   :  { %p582_p8 = scmp.ne.s32.totalorder %s776_s0, %s581_s9  ;;  %p585_p9 = scmp.lt.u32.totalorder %s581_s9, %s776_s0 }
  0x19   :  { %p587_p10 = pnand %p585_p9, %p582_p8 }
  0x1b   :  { %590 = shalt.err (!%p587_p10)
}
  0x1c   :  { %s591_s1 = scalar_lea.vmem %s21_s30, 16  ;;  %s595_s14 = scalar_lea.vmem %s21_s30, 32 }
  0x1d   :  { %p592_p11 = scmp.ne.s32.totalorder %s21_s30, %s591_s1  ;;  %p596_p12 = scmp.lt.s32.totalorder %s21_s30, %s21_s30 }
  0x1e   :  { %p597_p13 = scmp.lt.s32.totalorder %s595_s14, %s591_s1 }
  0x20   :  { %p598_p0 = por %p597_p13, %p596_p12 }
  0x22   :  { %p599_p1 = pnand %p598_p0, %p592_p11 }
  0x24   :  { %602 = shalt.err (!%p599_p1)
}
  0x25   :  { %23 = dma.hbm_to_vmem [thread:$0]  %s776_s0, 16, %s21_s30, [#allocation3]  }
  0x26   :  { %s603_s19 = scalar_lea.hbm %s778_s2, 4096 }
  0x27   :  { %p604_p2 = scmp.ne.s32.totalorder %s778_s2, %s603_s19  ;;  %p607_p3 = scmp.lt.u32.totalorder %s603_s19, %s778_s2 }
  0x29   :  { %p609_p4 = pnand %p607_p3, %p604_p2 }
  0x2b   :  { %612 = shalt.err (!%p609_p4)
}
  0x2c   :  { %s613_s24 = scalar_lea.vmem %s42_s6, 4096  ;;  %p618_p6 = scmp.lt.s32.totalorder %s42_s6, %s42_s6 }
  0x2d   :  { %p614_p5 = scmp.ne.s32.totalorder %s42_s6, %s613_s24  ;;  %p619_p7 = scmp.lt.s32.totalorder %s613_s24, %s613_s24 }
  0x2f   :  { %p620_p8 = por %p619_p7, %p618_p6 }
  0x31   :  { %p621_p9 = pnand %p620_p8, %p614_p5 }
  0x33   :  { %624 = shalt.err (!%p621_p9)
}
  0x34   :  { %s682_s0 = smov 256   ;;  %s683_s25 = smov 16  }
  0x35   :  { %47 = dma.hbm_to_vmem [thread:$0]  %s778_s2, 4096, %s42_s6, [#allocation6], %s682_s0, %s682_s0, %s683_s25  }
  0x36   :  { %669 = dma.done.wait [#allocation3], 16  }
  0x37   :  { %670 = vsyncadd [#allocation3], 4294967280 }
  0x38   :  { %671 = dma.done.wait [#allocation6], 12288  }
  0x39   :  { %672 = vsyncadd [#allocation6], 4294955008  ;;  %v684_v0 = vmov 0.0   ;;  %v59_v1 = vld [vmem:[#allocation5 + $0x8] sm:$0xff]  ;;  %v61_v3 = vld [vmem:[#allocation5 + $0x18] sm:$0xff]  ;;  %s686_s2 = smov [#allocation8]  }
  0x3a   :  { %186 = vmatprep.mubr.f32.mxu0 %v684_v0  ;;  %257 = vmatprep.mubr.f32.mxu1 %v684_v0  ;;  %v63_v2 = vld [vmem:[#allocation5 + $0x28] sm:$0xff]  ;;  %v65_v5 = vld [vmem:[#allocation5 + $0x38] sm:$0xff]  ;;  %v58_v6 = vld [vmem:[#allocation5] sm:$0xff]  ;;  %s428_s28 = sshll.u32 %s686_s2, 4  ;;  %s429_s28 = int_to_ptr.vmem [resolvable:$true] %s428_s28 }
  0x3b   :  { %v452_v4 = vpack.c.bf16 %v63_v2, %v59_v1  ;;  %v62_v7 = vld [vmem:[#allocation5 + $0x20] sm:$0xff]  ;;  %v484_v8 = vpack.c.bf16 %v65_v5, %v61_v3  ;;  %v60_v10 = vld [vmem:[#allocation5 + $0x10] sm:$0xff]  ;;  %v67_v12 = vld [vmem:[#allocation5 + $0x48] sm:$0xff]  ;;  %s625_s29 = scalar_lea.vmem %s429_s28, 64  ;;  %p630_p11 = scmp.lt.s32.totalorder %s429_s28, %s429_s28 }
  0x3c   :  { %v454_v9 = vpack.c.bf16 %v62_v7, %v58_v6  ;;  %v64_v11 = vld [vmem:[#allocation5 + $0x30] sm:$0xff]  ;;  %v71_v14 = vld [vmem:[#allocation5 + $0x68] sm:$0xff]  ;;  %v69_v15 = vld [vmem:[#allocation5 + $0x58] sm:$0xff]  ;;  %p626_p10 = scmp.ne.s32.totalorder %s429_s28, %s625_s29  ;;  %p631_p12 = scmp.lt.s32.totalorder %s625_s29, %s625_s29 }
  0x3d   :  { %453 = vmatprep.subr.bf16.mxu0 %v452_v4  ;;  %v486_v13 = vpack.c.bf16 %v64_v11, %v60_v10  ;;  %v73_v16 = vld [vmem:[#allocation5 + $0x78] sm:$0xff]  ;;  %485 = vmatprep.subr.bf16.mxu1 %v484_v8  ;;  %v456_v17 = vpack.c.bf16 %v71_v14, %v67_v12  ;;  %v66_v19 = vld [vmem:[#allocation5 + $0x40] sm:$0xff]  ;;  %v68_v21 = vld [vmem:[#allocation5 + $0x50] sm:$0xff] }
  0x3e   :  { %455 = vmatpush1.bf16.msra.mxu0 %v454_v9  ;;  %v488_v18 = vpack.c.bf16 %v73_v16, %v69_v15  ;;  %v70_v20 = vld [vmem:[#allocation5 + $0x60] sm:$0xff]  ;;  %v72_v23 = vld [vmem:[#allocation5 + $0x70] sm:$0xff]  ;;  %v75_v24 = vld [vmem:[#allocation5 + $0x88] sm:$0xff]  ;;  %p632_p13 = por %p631_p12, %p630_p11 }
  0x3f   :  { %487 = vmatpush1.bf16.msra.mxu1 %v486_v13  ;;  %v458_v22 = vpack.c.bf16 %v70_v20, %v66_v19  ;;  %v79_v25 = vld [vmem:[#allocation5 + $0xa8] sm:$0xff]  ;;  %457 = vmatprep.subr.bf16.mxu0 %v456_v17  ;;  %v490_v26 = vpack.c.bf16 %v72_v23, %v68_v21  ;;  %v77_v28 = vld [vmem:[#allocation5 + $0x98] sm:$0xff]  ;;  %v74_v30 = vld [vmem:[#allocation5 + $0x80] sm:$0xff] }
  0x40   :  { %489 = vmatprep.subr.bf16.mxu1 %v488_v18  ;;  %v460_v27 = vpack.c.bf16 %v79_v25, %v75_v24  ;;  %v81_v29 = vld [vmem:[#allocation5 + $0xb8] sm:$0xff]  ;;  %v78_v32 = vld [vmem:[#allocation5 + $0xa0] sm:$0xff]  ;;  %v76_v33 = vld [vmem:[#allocation5 + $0x90] sm:$0xff]  ;;  %p633_p0 = pnand %p632_p13, %p626_p10 }
  0x41   :  { %v492_v31 = vpack.c.bf16 %v81_v29, %v77_v28  ;;  %v80_v34 = vld [vmem:[#allocation5 + $0xb0] sm:$0xff]  ;;  %v462_v35 = vpack.c.bf16 %v78_v32, %v74_v30  ;;  %v83_v36 = vld [vmem:[#allocation5 + $0xc8] sm:$0xff]  ;;  %v85_v38 = vld [vmem:[#allocation5 + $0xd8] sm:$0xff] }
  0x42   :  { %459 = vmatpush1.bf16.msra.mxu0 %v458_v22  ;;  %v87_v37 = vld [vmem:[#allocation5 + $0xe8] sm:$0xff]  ;;  %v494_v39 = vpack.c.bf16 %v80_v34, %v76_v33  ;;  %v89_v41 = vld [vmem:[#allocation5 + $0xf8] sm:$0xff]  ;;  %v82_v42 = vld [vmem:[#allocation5 + $0xc0] sm:$0xff] }
  0x43   :  { %491 = vmatpush1.bf16.msra.mxu1 %v490_v26  ;;  %461 = vmatprep.subr.bf16.mxu0 %v460_v27  ;;  %v464_v40 = vpack.c.bf16 %v87_v37, %v83_v36  ;;  %v86_v43 = vld [vmem:[#allocation5 + $0xe0] sm:$0xff]  ;;  %v496_v44 = vpack.c.bf16 %v89_v41, %v85_v38  ;;  %v84_v45 = vld [vmem:[#allocation5 + $0xd0] sm:$0xff]  ;;  %v91_v47 = vld [vmem:[#allocation5 + $0x108] sm:$0xff] }
  0x44   :  { %493 = vmatprep.subr.bf16.mxu1 %v492_v31  ;;  %v88_v46 = vld [vmem:[#allocation5 + $0xf0] sm:$0xff]  ;;  %v95_v48 = vld [vmem:[#allocation5 + $0x128] sm:$0xff]  ;;  %v93_v49 = vld [vmem:[#allocation5 + $0x118] sm:$0xff]  ;;  %v466_v51 = vpack.c.bf16 %v86_v43, %v82_v42 }
  0x45   :  { %v97_v50 = vld [vmem:[#allocation5 + $0x138] sm:$0xff]  ;;  %v498_v52 = vpack.c.bf16 %v88_v46, %v84_v45  ;;  %v468_v53 = vpack.c.bf16 %v95_v48, %v91_v47  ;;  %v90_v54 = vld [vmem:[#allocation5 + $0x100] sm:$0xff]  ;;  %v92_v56 = vld [vmem:[#allocation5 + $0x110] sm:$0xff] }
  0x46   :  { %463 = vmatpush1.bf16.msra.mxu0 %v462_v35  ;;  %v94_v55 = vld [vmem:[#allocation5 + $0x120] sm:$0xff]  ;;  %v500_v57 = vpack.c.bf16 %v97_v50, %v93_v49  ;;  %v96_v58 = vld [vmem:[#allocation5 + $0x130] sm:$0xff]  ;;  %v99_v59 = vld [vmem:[#allocation5 + $0x148] sm:$0xff] }
  0x47   :  { %495 = vmatpush1.bf16.msra.mxu1 %v494_v39  ;;  %465 = vmatprep.subr.bf16.mxu0 %v464_v40  ;;  %v103_v60 = vld [vmem:[#allocation5 + $0x168] sm:$0xff]  ;;  %v101_v61 = vld [vmem:[#allocation5 + $0x158] sm:$0xff]  ;;  %v470_v63 = vpack.c.bf16 %v94_v55, %v90_v54  ;;  %v502_v1 = vpack.c.bf16 %v96_v58, %v92_v56  ;;  %v98_v3 = vld [vmem:[#allocation5 + $0x140] sm:$0xff] }
  0x48   :  { %497 = vmatprep.subr.bf16.mxu1 %v496_v44  ;;  %v105_v62 = vld [vmem:[#allocation5 + $0x178] sm:$0xff]  ;;  %v472_v2 = vpack.c.bf16 %v103_v60, %v99_v59  ;;  %v102_v4 = vld [vmem:[#allocation5 + $0x160] sm:$0xff]  ;;  %v100_v5 = vld [vmem:[#allocation5 + $0x150] sm:$0xff] }
  0x49   :  { %v504_v6 = vpack.c.bf16 %v105_v62, %v101_v61  ;;  %v104_v7 = vld [vmem:[#allocation5 + $0x170] sm:$0xff]  ;;  %v107_v8 = vld [vmem:[#allocation5 + $0x188] sm:$0xff]  ;;  %v109_v10 = vld [vmem:[#allocation5 + $0x198] sm:$0xff]  ;;  %v474_v12 = vpack.c.bf16 %v102_v4, %v98_v3 }
  0x4a   :  { %467 = vmatpush1.bf16.msra.mxu0 %v466_v51  ;;  %v111_v9 = vld [vmem:[#allocation5 + $0x1a8] sm:$0xff]  ;;  %v113_v11 = vld [vmem:[#allocation5 + $0x1b8] sm:$0xff]  ;;  %v506_v13 = vpack.c.bf16 %v104_v7, %v100_v5  ;;  %v106_v15 = vld [vmem:[#allocation5 + $0x180] sm:$0xff] }
  0x4b   :  { %499 = vmatpush1.bf16.msra.mxu1 %v498_v52  ;;  %469 = vmatprep.subr.bf16.mxu0 %v468_v53  ;;  %v476_v14 = vpack.c.bf16 %v111_v9, %v107_v8  ;;  %v110_v16 = vld [vmem:[#allocation5 + $0x1a0] sm:$0xff]  ;;  %v108_v17 = vld [vmem:[#allocation5 + $0x190] sm:$0xff]  ;;  %v508_v18 = vpack.c.bf16 %v113_v11, %v109_v10  ;;  %v115_v20 = vld [vmem:[#allocation5 + $0x1c8] sm:$0xff] }
  0x4c   :  { %501 = vmatprep.subr.bf16.mxu1 %v500_v57  ;;  %v112_v19 = vld [vmem:[#allocation5 + $0x1b0] sm:$0xff]  ;;  %v119_v21 = vld [vmem:[#allocation5 + $0x1e8] sm:$0xff]  ;;  %v117_v22 = vld [vmem:[#allocation5 + $0x1d8] sm:$0xff]  ;;  %v478_v24 = vpack.c.bf16 %v110_v16, %v106_v15 }
  0x4d   :  { %v121_v23 = vld [vmem:[#allocation5 + $0x1f8] sm:$0xff]  ;;  %v510_v25 = vpack.c.bf16 %v112_v19, %v108_v17  ;;  %v480_v26 = vpack.c.bf16 %v119_v21, %v115_v20  ;;  %v114_v27 = vld [vmem:[#allocation5 + $0x1c0] sm:$0xff]  ;;  %v116_v29 = vld [vmem:[#allocation5 + $0x1d0] sm:$0xff]  ;;  %v685_v19 = vmov 1966171168   ;;  %v273_v21 = vlaneseq }
  0x4e   :  { %471 = vmatpush1.bf16.msra.mxu0 %v470_v63  ;;  %v118_v28 = vld [vmem:[#allocation5 + $0x1e0] sm:$0xff]  ;;  %v512_v30 = vpack.c.bf16 %v121_v23, %v117_v22  ;;  %v120_v31 = vld [vmem:[#allocation5 + $0x1f0] sm:$0xff]  ;;  %v299_v32 = vld [vmem:[#allocation7 + $0x8] sm:$0xff]  ;;  %v271_v20 = vunpack.c.l.s4 %v685_v19 }
  0x4f   :  { %503 = vmatpush1.bf16.msra.mxu1 %v502_v1  ;;  %473 = vmatprep.subr.bf16.mxu0 %v472_v2  ;;  %v301_v33 = vld [vmem:[#allocation7 + $0x18] sm:$0xff]  ;;  %v482_v34 = vpack.c.bf16 %v118_v28, %v114_v27  ;;  %v514_v35 = vpack.c.bf16 %v120_v31, %v116_v29  ;;  %v298_v37 = vld [vmem:[#allocation7] sm:$0xff]  ;;  %v300_v38 = vld [vmem:[#allocation7 + $0x10] sm:$0xff]  ;;  %v274_v23 = vshrl.u32 %v273_v21, 7  ;;  %vm295_vm0 = vcmp.lt.s32.totalorder %v273_v21, 512 }
  0x50   :  { %505 = vmatprep.subr.bf16.mxu1 %v504_v6  ;;  %v516_v36 = vpack.c.bf16 %v301_v33, %v299_v32  ;;  %v303_v39 = vld [vmem:[#allocation7 + $0x28] sm:$0xff]  ;;  %v305_v40 = vld [vmem:[#allocation7 + $0x38] sm:$0xff]  ;;  %v518_v42 = vpack.c.bf16 %v300_v38, %v298_v37  ;;  %v302_v44 = vld [vmem:[#allocation7 + $0x20] sm:$0xff]  ;;  %v272_v22 = vunpack.c.0.s8 %v271_v20 }
  0x51   :  { %v57_v41 = vld [vmem:[#allocation2] sm:$0x1]  ;;  %v520_v43 = vpack.c.bf16 %v305_v40, %v303_v39  ;;  %v304_v45 = vld [vmem:[#allocation7 + $0x30] sm:$0xff]  ;;  %v307_v46 = vld [vmem:[#allocation7 + $0x48] sm:$0xff] }
  0x52   :  { %475 = vmatpush1.bf16.msra.mxu0 %v474_v12  ;;  %v309_v47 = vld [vmem:[#allocation7 + $0x58] sm:$0xff]  ;;  %v522_v48 = vpack.c.bf16 %v304_v45, %v302_v44  ;;  %v306_v50 = vld [vmem:[#allocation7 + $0x40] sm:$0xff]  ;;  %v308_v51 = vld [vmem:[#allocation7 + $0x50] sm:$0xff] }
  0x53   :  { %507 = vmatpush1.bf16.msra.mxu1 %v506_v13  ;;  %477 = vmatprep.subr.bf16.mxu0 %v476_v14  ;;  %v524_v49 = vpack.c.bf16 %v309_v47, %v307_v46  ;;  %v311_v52 = vld [vmem:[#allocation7 + $0x68] sm:$0xff]  ;;  %v313_v53 = vld [vmem:[#allocation7 + $0x78] sm:$0xff]  ;;  %v526_v54 = vpack.c.bf16 %v308_v51, %v306_v50  ;;  %v310_v56 = vld [vmem:[#allocation7 + $0x60] sm:$0xff] }
  0x54   :  { %509 = vmatprep.subr.bf16.mxu1 %v508_v18  ;;  %v528_v55 = vpack.c.bf16 %v313_v53, %v311_v52  ;;  %v312_v57 = vld [vmem:[#allocation7 + $0x70] sm:$0xff]  ;;  %v315_v58 = vld [vmem:[#allocation7 + $0x88] sm:$0xff]  ;;  %v317_v59 = vld [vmem:[#allocation7 + $0x98] sm:$0xff] }
  0x55   :  { %v530_v60 = vpack.c.bf16 %v312_v57, %v310_v56  ;;  %v532_v61 = vpack.c.bf16 %v317_v59, %v315_v58  ;;  %v314_v62 = vld [vmem:[#allocation7 + $0x80] sm:$0xff]  ;;  %v316_v63 = vld [vmem:[#allocation7 + $0x90] sm:$0xff]  ;;  %v319_v1 = vld [vmem:[#allocation7 + $0xa8] sm:$0xff] }
  0x56   :  { %479 = vmatpush1.bf16.msra.mxu0 %v478_v24  ;;  %v321_v2 = vld [vmem:[#allocation7 + $0xb8] sm:$0xff]  ;;  %v318_v4 = vld [vmem:[#allocation7 + $0xa0] sm:$0xff]  ;;  %v320_v5 = vld [vmem:[#allocation7 + $0xb0] sm:$0xff] }
  0x57   :  { %511 = vmatpush1.bf16.msra.mxu1 %v510_v25  ;;  %481 = vmatprep.subr.bf16.mxu0 %v480_v26  ;;  %v536_v3 = vpack.c.bf16 %v321_v2, %v319_v1  ;;  %v323_v6 = vld [vmem:[#allocation7 + $0xc8] sm:$0xff]  ;;  %v325_v7 = vld [vmem:[#allocation7 + $0xd8] sm:$0xff]  ;;  %v538_v8 = vpack.c.bf16 %v320_v5, %v318_v4  ;;  %v322_v10 = vld [vmem:[#allocation7 + $0xc0] sm:$0xff]  ;;  %v275_v25 = vsub.s32 %v272_v22, %v274_v23 }
  0x58   :  { %513 = vmatprep.subr.bf16.mxu1 %v512_v30  ;;  %v540_v9 = vpack.c.bf16 %v325_v7, %v323_v6  ;;  %v324_v11 = vld [vmem:[#allocation7 + $0xd0] sm:$0xff]  ;;  %v327_v12 = vld [vmem:[#allocation7 + $0xe8] sm:$0xff]  ;;  %v329_v13 = vld [vmem:[#allocation7 + $0xf8] sm:$0xff] }
  0x59   :  { %v542_v14 = vpack.c.bf16 %v324_v11, %v322_v10  ;;  %v544_v15 = vpack.c.bf16 %v329_v13, %v327_v12  ;;  %v326_v16 = vld [vmem:[#allocation7 + $0xe0] sm:$0xff]  ;;  %v328_v17 = vld [vmem:[#allocation7 + $0xf0] sm:$0xff] }
  0x5a   :  { %483 = vmatpush1.bf16.msra.mxu0 %v482_v34  ;;  %v546_v18 = vpack.c.bf16 %v328_v17, %v326_v16 }
  0x5b   :  { %515 = vmatpush1.bf16.msra.mxu1 %v514_v35  ;;  %517 = vmatprep.subr.bf16.mxu0 %v516_v36 }
  0x5d   :  { %187 = vmatmul.mubr.f32.vlgmr.msra.gmra.mrb[0].mxu0 %v57_v41 }
  0x5e   :  { %258 = vmatmul.mubr.f32.vlgmr.msra.gmra.mrb[0].mxu1 %v57_v41  ;;  %519 = vmatpush1.bf16.msra.mxu0 %v518_v42 }
  0x5f   :  { %521 = vmatprep.subr.bf16.mxu0 %v520_v43  ;;  %394 = vmatprep.mubr.f32.mxu0 %v684_v0  ;;  %v534_v0 = vpack.c.bf16 %v316_v63, %v314_v62 }
  0x62   :  { %523 = vmatpush1.bf16.msra.mxu0 %v522_v48 }
  0x63   :  { %525 = vmatprep.subr.bf16.mxu0 %v524_v49 }
  0x66   :  { %527 = vmatpush1.bf16.msra.mxu0 %v526_v54 }
  0x67   :  { %529 = vmatprep.subr.bf16.mxu0 %v528_v55 }
  0x6a   :  { %531 = vmatpush1.bf16.msra.mxu0 %v530_v60 }
  0x6b   :  { %533 = vmatprep.subr.bf16.mxu0 %v532_v61 }
  0x6e   :  { %535 = vmatpush1.bf16.msra.mxu0 %v534_v0 }
  0x6f   :  { %537 = vmatprep.subr.bf16.mxu0 %v536_v3 }
  0x72   :  { %539 = vmatpush1.bf16.msra.mxu0 %v538_v8 }
  0x73   :  { %541 = vmatprep.subr.bf16.mxu0 %v540_v9 }
  0x76   :  { %543 = vmatpush1.bf16.msra.mxu0 %v542_v14 }
  0x77   :  { %545 = vmatprep.subr.bf16.mxu0 %v544_v15 }
  0x7a   :  { %547 = vmatpush1.bf16.msra.mxu0 %v546_v18 }
  0x7d   :  { %395 = vmatmul.mubr.f32.vlgmr.msra.gmra.mrb[2].mxu0 %v57_v41 }
 0x130   :  { %v188_v24 = vpop.f32.mrb[0].mxu0 }
 0x131   :  { %v259_v26 = vpop.f32.mrb[0].mxu1  ;;  %v190_v27 = vpop.f32.mrb[1].mxu0 }
 0x132   :  { %v268_v28 = vcombine.low %v188_v24, %v190_v27  ;;  %v261_v29 = vpop.f32.mrb[1].mxu1 }
 0x133   :  { %v269_v30 = vcombine.low %v259_v26, %v261_v29 }
 0x134   :  { %v276_v31 = vrot.slane %v268_v28, %v275_v25 }
 0x135   :  { %v283_v32 = vrot.slane %v269_v30, %v275_v25 }
 0x137   :  { %v284_v33 = vcombine.low %v276_v31, %v283_v32 }
 0x139   :  { %v291_v34 = vrot.slane %v284_v33, %v275_v25 }
 0x13b   :  { %297 = vst.msk [vmem:[#allocation8] sm:$0xf] %vm295_vm0, %v291_v34 }
 0x13c   :  { %636 = shalt.err (!%p633_p0)
}
 0x13d   :  { %s637_s6 = scalar_lea.hbm %s779_s3, 64 }
 0x13e   :  { %p638_p1 = scmp.ne.s32.totalorder %s779_s3, %s637_s6  ;;  %p641_p2 = scmp.lt.u32.totalorder %s637_s6, %s779_s3 }
 0x140   :  { %p643_p3 = pnand %p641_p2, %p638_p1 }
 0x142   :  { %646 = shalt.err (!%p643_p3)
}
 0x143   :  { %431 = dma.vmem_to_hbm [thread:$0]  %s429_s28, 64, %s779_s3, [#allocation4]   ;;  %vm419_vm1 = vcmp.lt.s32.totalorder %v273_v21, 256 }
 0x144   :  { %s687_s13 = smov [#allocation9]  }
 0x145   :  { %s438_s1 = sshll.u32 %s687_s13, 4  ;;  %s439_s1 = int_to_ptr.vmem [resolvable:$true] %s438_s1 }
 0x146   :  { %s647_s14 = scalar_lea.vmem %s439_s1, 32  ;;  %p652_p5 = scmp.lt.s32.totalorder %s439_s1, %s439_s1 }
 0x147   :  { %p648_p4 = scmp.ne.s32.totalorder %s439_s1, %s647_s14  ;;  %p653_p6 = scmp.lt.s32.totalorder %s647_s14, %s647_s14 }
 0x149   :  { %p654_p7 = por %p653_p6, %p652_p5 }
 0x14b   :  { %p655_p8 = pnand %p654_p7, %p648_p4 }
 0x150   :  { %v396_v35 = vpop.f32.mrb[2].mxu0 }
 0x151   :  { %v398_v36 = vpop.f32.mrb[3].mxu0 }
 0x152   :  { %v403_v37 = vcombine.low %v396_v35, %v398_v36 }
 0x154   :  { %v410_v38 = vrot.slane %v403_v37, %v275_v25 }
 0x156   :  { %v417_v39 = vrot.slane %v410_v38, %v275_v25 }
 0x158   :  { %421 = vst.msk [vmem:[#allocation9] sm:$0x3] %vm419_vm1, %v417_v39 }
 0x159   :  { %658 = shalt.err (!%p655_p8)
}
 0x15a   :  { %s659_s3 = scalar_lea.hbm %s780_s4, 32 }
 0x15b   :  { %p660_p9 = scmp.ne.s32.totalorder %s780_s4, %s659_s3  ;;  %p663_p10 = scmp.lt.u32.totalorder %s659_s3, %s780_s4 }
 0x15d   :  { %p665_p11 = pnand %p663_p10, %p660_p9 }
 0x15f   :  { %668 = shalt.err (!%p665_p11)
}
 0x160   :  { %441 = dma.vmem_to_hbm [thread:$0]  %s439_s1, 32, %s780_s4, [#allocation10]  }
 0x161   :  { %673 = dma.done.wait [#allocation4], 64  }
 0x162   :  { %674 = vsyncadd [#allocation4], 4294967232 }
 0x163   :  { %675 = dma.done.wait [#allocation10], 32  }
 0x164   :  { %676 = vsyncadd [#allocation10], 4294967264 }
 0x165   :  { %448 = vsyncpa [#allocation3], 1 }
 0x166   :  { %449 = vsyncpa [#allocation6], 1 }
 0x167   :  { %450 = vsyncpa [#allocation4], 1 }
 0x168   :  { %451 = vsyncpa [#allocation10], 1 }

</bundles_post_ra>
